<compile_context>
chip_gen: v5e
topology: v5e:2x2
jax: 0.10.0
libtpu: 0.0.40
codegen_flags: <defaults>
</compile_context>

<pallas_src>
import functools

import jax
import jax.numpy as jnp
from jax import lax
from jax.experimental import pallas as pl
from jax.experimental.pallas import tpu as pltpu


def _edge_kernel_flat(x_ref, o_ref, *, H, W):
    """Lane-dense path: x_ref/o_ref are (Nb, H*W), one flattened plane per row."""
    x = x_ref[...]
    HW = H * W

    j = lax.broadcasted_iota(jnp.int32, x.shape, 1)   # flat pixel index (lane)
    cmod = j % W                                      # column within the plane

    # Row taps with a zero halo above/below the plane.
    # pltpu.roll matches jnp.roll: roll(x, +s)[j] == x[j - s] (cyclic).
    top = jnp.where(j < W, 0.0, pltpu.roll(x, W, axis=1))                 # x[i-1, c]
    bot = jnp.where(j >= (H - 1) * W, 0.0, pltpu.roll(x, HW - W, axis=1)) # x[i+1, c]

    S = top + x + bot      # 3-row column sum      (for the vertical filter)
    D = bot - top          # bottom-minus-top diff (for the horizontal filter)

    # Column taps with a zero halo at the left/right plane edge.
    s_l = jnp.where(cmod == 0, 0.0, pltpu.roll(S, 1, axis=1))
    s_r = jnp.where(cmod == W - 1, 0.0, pltpu.roll(S, HW - 1, axis=1))
    d_l = jnp.where(cmod == 0, 0.0, pltpu.roll(D, 1, axis=1))
    d_r = jnp.where(cmod == W - 1, 0.0, pltpu.roll(D, HW - 1, axis=1))

    vert = s_r - s_l            # cross-corr with [[-1,0,1]]*3
    horz = d_l + D + d_r        # cross-corr with [[-1]*3, [0]*3, [1]*3]
    o_ref[...] = jnp.sqrt(vert * vert + horz * horz)


def _edge_kernel_padded(x_ref, o_ref):
    """Fallback (lane-sparse) path for H*W not a multiple of 128: (Nb, H, W) block."""
    x = x_ref[...]
    Nb, H, W = x.shape
    zrow = jnp.zeros((Nb, 1, W), x.dtype)
    xr = jnp.concatenate([zrow, x, zrow], axis=1)          # (Nb, H+2, W)
    zcol = jnp.zeros((Nb, H + 2, 1), x.dtype)
    xp = jnp.concatenate([zcol, xr, zcol], axis=2)         # (Nb, H+2, W+2)
    top, mid, bot = xp[:, 0:H, :], xp[:, 1:H + 1, :], xp[:, 2:H + 2, :]
    S = top + mid + bot
    D = bot - top
    vert = S[:, :, 2:W + 2] - S[:, :, 0:W]
    horz = D[:, :, 0:W] + D[:, :, 1:W + 1] + D[:, :, 2:W + 2]
    o_ref[...] = jnp.sqrt(vert * vert + horz * horz)


def _chip_vmem_bytes():
    """Per-core VMEM capacity; conservative default if the query is unavailable."""
    try:
        cap = getattr(pltpu.get_tpu_info(), "vmem_capacity_bytes", None)
        if cap:
            return int(cap)
    except Exception:
        pass
    return 64 << 20  # v7x per-TensorCore size (v5e/v6e have 128 MiB)


def _pick_batch_block(N, plane_bytes, vmem_budget, sublane_align=1):
    """Planes per grid step.

    Upper bound: double-buffered in/out blocks plus ~4 plane-sized in-kernel
    temporaries (S, D, rolled taps) must fit the scoped-VMEM budget.
    Lower bound: blocks >= ~512 KiB keep the ~0.35us/step overhead amortized.
    Target: >= 8 grid steps (>= 4 per v7x TensorCore) when the batch allows it.
    """
    per_plane_vmem = 8 * plane_bytes
    nb_cap = max(1, vmem_budget // per_plane_vmem)
    nb_floor = pl.cdiv(512 * 1024, plane_bytes)
    nb_target = pl.cdiv(N, 8)
    nb = min(N, nb_cap, max(nb_target, nb_floor))
    if nb < N and sublane_align > 1:
        # Split batch blocks must keep the sublane dim (8,128)-friendly.
        nb = min(N, max(sublane_align, (nb // sublane_align) * sublane_align))
    return max(1, nb)


def edge_detector(im):
    """im: (N, 1, H, W) float32 -> (N, 1, H, W), matching the PyTorch module."""
    N, C, H, W = im.shape
    assert C == 1, "EdgeDetector expects a single channel"
    HW = H * W
    plane_bytes = HW * im.dtype.itemsize

    vmem_cap = _chip_vmem_bytes()
    budget = min(vmem_cap // 2, 48 << 20)   # pipelined buffers + temporaries target

    if HW % 128 == 0:
        # Lane-dense path: flatten each plane along the lane axis (free reshape).
        Nb = _pick_batch_block(N, plane_bytes, budget, sublane_align=8)
        kernel = functools.partial(_edge_kernel_flat, H=H, W=W)
        x = im.reshape(N, HW)
        in_specs = [pl.BlockSpec((Nb, HW), lambda g: (g, 0))]
        out_specs = pl.BlockSpec((Nb, HW), lambda g: (g, 0))
        out_shape = jax.ShapeDtypeStruct((N, HW), im.dtype)
    else:
        # Fallback: keep (H, W) as the last two block dims (full-dim blocks are
        # exempt from the (8,128) constraint) and build the zero halo in-kernel.
        Nb = _pick_batch_block(N, plane_bytes, budget)
        kernel = _edge_kernel_padded
        x = im.reshape(N, H, W)
        in_specs = [pl.BlockSpec((Nb, H, W), lambda g: (g, 0, 0))]
        out_specs = pl.BlockSpec((Nb, H, W), lambda g: (g, 0, 0))
        out_shape = jax.ShapeDtypeStruct((N, H, W), im.dtype)

    grid = (pl.cdiv(N, Nb),)   # ragged tail block is harmless: kernel is elementwise
    vmem_limit = int(min(vmem_cap * 3 // 4,
                         max(32 << 20, 8 * Nb * plane_bytes + (4 << 20))))

    out = pl.pallas_call(
        kernel,
        out_shape=out_shape,
        grid_spec=pltpu.PrefetchScalarGridSpec(
            num_scalar_prefetch=0,
            grid=grid,
            in_specs=in_specs,
            out_specs=out_specs,
        ),
        compiler_params=pltpu.CompilerParams(
            dimension_semantics=("parallel",),
            vmem_limit_bytes=vmem_limit,
        ),
        cost_estimate=pl.CostEstimate(
            flops=16 * N * HW,
            transcendentals=N * HW,
            bytes_accessed=2 * N * plane_bytes,
        ),
    )(x)
    return out.reshape(N, 1, H, W)


def _reference(im):
    """Pure-JAX reference using lax.conv (cross-correlation, matching nn.Conv2d)."""
    w_vert = jnp.array([[[[-1., 0., 1.], [-1., 0., 1.], [-1., 0., 1.]]]], jnp.float32)
    w_horz = jnp.array([[[[-1., -1., -1.], [0., 0., 0.], [1., 1., 1.]]]], jnp.float32)
    conv = lambda x, w: lax.conv_general_dilated(
        x, w, window_strides=(1, 1), padding=((1, 1), (1, 1)),
        dimension_numbers=("NCHW", "OIHW", "NCHW"))
    return jnp.sqrt(conv(im, w_vert) ** 2 + conv(im, w_horz) ** 2)


if __name__ == "__main__":
    key = jax.random.PRNGKey(0)
    im = jax.random.normal(key, (2, 1, 16, 16), dtype=jnp.float32)

    out = jax.block_until_ready(edge_detector(im))

    ref = _reference(im)
    assert out.shape == ref.shape == (2, 1, 16, 16)
    assert jnp.allclose(out, ref, atol=1e-5, rtol=1e-5)

    print("KERNEL_OK")
</pallas_src>

<mosaic_0001>
module attributes {stable_mosaic.version = 11 : i64} {
  func.func @_edge_kernel_flat(%arg0: i32, %arg1: memref<2x256xf32, #tpu.memory_space<vmem>>, %arg2: memref<2x256xf32, #tpu.memory_space<vmem>>) attributes {dimension_semantics = [#tpu.dimension_semantics<parallel>], iteration_bounds = array<i64: 1>, scalar_prefetch = 0 : i64, scratch_operands = 0 : i64, tpu.core_type = #tpu.core_type<tc>, window_params = [{transform_indices = @transform_0, window_bounds = array<i64: 2, 256>}, {transform_indices = @transform_1, window_bounds = array<i64: 2, 256>}]} {
    %c0 = arith.constant 0 : index
    %c0_0 = arith.constant 0 : index
    %0 = vector.load %arg1[%c0, %c0_0] : memref<2x256xf32, #tpu.memory_space<vmem>>, vector<2x256xf32>
    %1 = tpu.iota {dimensions = array<i32: 1>} : vector<2x256xi32>
    %c16_i32 = arith.constant 16 : i32
    %c0_i32 = arith.constant 0 : i32
    %2 = arith.cmpi eq, %c16_i32, %c0_i32 : i32
    %c1_i32 = arith.constant 1 : i32
    %3 = arith.select %2, %c1_i32, %c16_i32 : i32
    %4 = vector.broadcast %3 : i32 to vector<2x256xi32>
    %5 = arith.remsi %1, %4 : vector<2x256xi32>
    %c0_i32_1 = arith.constant 0 : i32
    %6 = vector.broadcast %c0_i32_1 : i32 to vector<2x256xi32>
    %7 = arith.cmpi ne, %5, %6 : vector<2x256xi32>
    %c0_i32_2 = arith.constant 0 : i32
    %8 = vector.broadcast %c0_i32_2 : i32 to vector<2x256xi32>
    %9 = arith.cmpi slt, %5, %8 : vector<2x256xi32>
    %c0_i32_3 = arith.constant 0 : i32
    %10 = arith.cmpi slt, %3, %c0_i32_3 : i32
    %11 = vector.broadcast %10 : i1 to vector<2x256xi1>
    %12 = vector.broadcast %11 : vector<2x256xi1> to vector<2x256xi1>
    %13 = arith.xori %9, %12 : vector<2x256xi1>
    %14 = arith.andi %13, %7 : vector<2x256xi1>
    %15 = vector.broadcast %3 : i32 to vector<2x256xi32>
    %16 = arith.addi %5, %15 : vector<2x256xi32>
    %17 = arith.select %14, %16, %5 : vector<2x256xi1>, vector<2x256xi32>
    %c16_i32_4 = arith.constant 16 : i32
    %18 = vector.broadcast %c16_i32_4 : i32 to vector<2x256xi32>
    %19 = arith.cmpi slt, %1, %18 : vector<2x256xi32>
    %c16_i32_5 = arith.constant 16 : i32
    %20 = tpu.dynamic_rotate %0 by %c16_i32_5 dim 1 : vector<2x256xf32>, i32 -> vector<2x256xf32>
    %cst = arith.constant 0.000000e+00 : f32
    %21 = vector.broadcast %cst : f32 to vector<2x256xf32>
    %22 = arith.select %19, %21, %20 : vector<2x256xi1>, vector<2x256xf32>
    %c240_i32 = arith.constant 240 : i32
    %23 = vector.broadcast %c240_i32 : i32 to vector<2x256xi32>
    %24 = arith.cmpi sge, %1, %23 : vector<2x256xi32>
    %c240_i32_6 = arith.constant 240 : i32
    %25 = tpu.dynamic_rotate %0 by %c240_i32_6 dim 1 : vector<2x256xf32>, i32 -> vector<2x256xf32>
    %cst_7 = arith.constant 0.000000e+00 : f32
    %26 = vector.broadcast %cst_7 : f32 to vector<2x256xf32>
    %27 = arith.select %24, %26, %25 : vector<2x256xi1>, vector<2x256xf32>
    %28 = arith.addf %22, %0 : vector<2x256xf32>
    %29 = arith.addf %28, %27 : vector<2x256xf32>
    %30 = arith.subf %27, %22 : vector<2x256xf32>
    %c0_i32_8 = arith.constant 0 : i32
    %31 = vector.broadcast %c0_i32_8 : i32 to vector<2x256xi32>
    %32 = arith.cmpi eq, %17, %31 : vector<2x256xi32>
    %c1_i32_9 = arith.constant 1 : i32
    %33 = tpu.dynamic_rotate %29 by %c1_i32_9 dim 1 : vector<2x256xf32>, i32 -> vector<2x256xf32>
    %cst_10 = arith.constant 0.000000e+00 : f32
    %34 = vector.broadcast %cst_10 : f32 to vector<2x256xf32>
    %35 = arith.select %32, %34, %33 : vector<2x256xi1>, vector<2x256xf32>
    %c15_i32 = arith.constant 15 : i32
    %36 = vector.broadcast %c15_i32 : i32 to vector<2x256xi32>
    %37 = arith.cmpi eq, %17, %36 : vector<2x256xi32>
    %c255_i32 = arith.constant 255 : i32
    %38 = tpu.dynamic_rotate %29 by %c255_i32 dim 1 : vector<2x256xf32>, i32 -> vector<2x256xf32>
    %cst_11 = arith.constant 0.000000e+00 : f32
    %39 = vector.broadcast %cst_11 : f32 to vector<2x256xf32>
    %40 = arith.select %37, %39, %38 : vector<2x256xi1>, vector<2x256xf32>
    %c0_i32_12 = arith.constant 0 : i32
    %41 = vector.broadcast %c0_i32_12 : i32 to vector<2x256xi32>
    %42 = arith.cmpi eq, %17, %41 : vector<2x256xi32>
    %c1_i32_13 = arith.constant 1 : i32
    %43 = tpu.dynamic_rotate %30 by %c1_i32_13 dim 1 : vector<2x256xf32>, i32 -> vector<2x256xf32>
    %cst_14 = arith.constant 0.000000e+00 : f32
    %44 = vector.broadcast %cst_14 : f32 to vector<2x256xf32>
    %45 = arith.select %42, %44, %43 : vector<2x256xi1>, vector<2x256xf32>
    %c15_i32_15 = arith.constant 15 : i32
    %46 = vector.broadcast %c15_i32_15 : i32 to vector<2x256xi32>
    %47 = arith.cmpi eq, %17, %46 : vector<2x256xi32>
    %c255_i32_16 = arith.constant 255 : i32
    %48 = tpu.dynamic_rotate %30 by %c255_i32_16 dim 1 : vector<2x256xf32>, i32 -> vector<2x256xf32>
    %cst_17 = arith.constant 0.000000e+00 : f32
    %49 = vector.broadcast %cst_17 : f32 to vector<2x256xf32>
    %50 = arith.select %47, %49, %48 : vector<2x256xi1>, vector<2x256xf32>
    %51 = arith.subf %40, %35 : vector<2x256xf32>
    %52 = arith.addf %45, %30 : vector<2x256xf32>
    %53 = arith.addf %52, %50 : vector<2x256xf32>
    %54 = arith.mulf %51, %51 : vector<2x256xf32>
    %55 = arith.mulf %53, %53 : vector<2x256xf32>
    %56 = arith.addf %54, %55 : vector<2x256xf32>
    %57 = math.sqrt %56 : vector<2x256xf32>
    %c0_18 = arith.constant 0 : index
    %c0_19 = arith.constant 0 : index
    %58 = vector.load %arg2[%c0_18, %c0_19] : memref<2x256xf32, #tpu.memory_space<vmem>>, vector<2x256xf32>
    tpu.vector_store %arg2[%c0_18, %c0_19], %57 {strides = array<i32>} : memref<2x256xf32, #tpu.memory_space<vmem>>, vector<2x256xf32>,
    return
  }
  func.func @transform_0(%arg0: i32) -> (i32, i32) {
    %c0_i32 = arith.constant 0 : i32
    %c0_i32_0 = arith.constant 0 : i32
    return %arg0, %c0_i32 : i32, i32
  }
  func.func @transform_1(%arg0: i32) -> (i32, i32) {
    %c0_i32 = arith.constant 0 : i32
    %c0_i32_0 = arith.constant 0 : i32
    return %arg0, %c0_i32 : i32, i32
  }
}

</mosaic_0001>

<bundles_post_ra>
// kernel: tpu_custom_call.1
= control target key start
LH: loop header
LB: loop body
LE: loop exit
PB: predicated region body
PF: predicated region fallthrough
CT: control target
= control target key end

     0   :  { %6 = vsyncpa [#allocation3], 0  ;;  %s316_s0 = inlined_call_operand.hbm [shape: f32[2,256], index: 0, kind: input, shape index: {}]   ;;  %s317_s1 = inlined_call_operand.hbm [shape: f32[2,256], index: 1, kind: output, shape index: {}]  }
   0x1   :  { %7 = vsyncpa [#allocation4], 0  ;;  %s13_s8 = sshll.u32 %s316_s0, 4  ;;  %s254_s9 = smov [#allocation2]   ;;  %s14_s8 = int_to_ptr.hbm [resolvable:$true] %s13_s8 }
   0x2   :  { %s15_s10 = sshll.u32 %s254_s9, 4  ;;  %s16_s10 = int_to_ptr.vmem [resolvable:$true] %s15_s10 }
   0x3   :  { %18 = dma.hbm_to_vmem [thread:$0]  %s14_s8, 64, %s16_s10, [#allocation3]  }
   0x4   :  { %250 = dma.done.wait [#allocation3], 64  }
   0x5   :  { %251 = vsyncadd [#allocation3], 4294967232  ;;  %v23_v0 = vld [vmem:[#allocation2] sm:$0xf]  ;;  %s255_s11 = smov 16   ;;  %s256_s12 = smov 112   ;;  %v24_v5 = vlaneseq }
   0x6   :  { %54 = vst [vmem:[#allocation1] ss:$4 sm:$0xff] %v23_v0  ;;  %s257_s0 = smov 1   ;;  %s258_s13 = smov 127   ;;  %vm171_vm12 = vcmask 1041408  }
   0x7   :  { %v273_v7 = vand.u32 127, %v24_v5  ;;  %s259_s14 = smov [#allocation5]   ;;  %s182_s18 = sshll.u32 %s317_s1, 4  ;;  %s183_s18 = int_to_ptr.hbm [resolvable:$true] %s182_s18 }
   0x8   :  { %s180_s15 = sshll.u32 %s259_s14, 4  ;;  %s181_s15 = int_to_ptr.vmem [resolvable:$true] %s180_s15 }
   0x9   :  { %vm51_vm0 = vcmp.lt.s32.totalorder %v273_v7, 16  ;;  %v26_v11 = vadd.s32 128, %v273_v7  ;;  %vm78_vm1 = vcmp.lt.s32.totalorder %v273_v7, 112  ;;  %v31_v28 = vand.u32 15, %v273_v7 }
   0xa   :  { %vm100_vm3 = vcmp.lt.s32.totalorder %v273_v7, 1  ;;  %vm111_vm6 = vcmp.lt.s32.totalorder %v273_v7, 127 }
   0xb   :  { %vm68_vm2 = vcmp.ge.s32.totalorder %v26_v11, 240  ;;  %v38_v29 = vand.u32 15, %v26_v11  ;;  %vm280_vm4 = vcmp.eq.s32.totalorder %v31_v28, 0  ;;  %vm293_vm7 = vcmp.eq.s32.totalorder %v31_v28, 15 }
   0xd   :  { %v55_v1 = vld.sshfl [vmem:[#allocation1] sm:$0xff pattern:$0x73625140]  ;;  %v56_v2 = vld.sshfl [vmem:[#allocation1 + $0x8] sm:$0xff pattern:$0x73625140] }
   0xe   :  { %59 = vrot.lane.b32.xlu0 %v55_v1, %s255_s11  ;;  %69 = vst [vmem:[#allocation1] ss:$4 sm:$0xff] %v23_v0  ;;  %vm284_vm5 = vcmp.eq.s32.totalorder %v38_v29, 0  ;;  %vm297_vm8 = vcmp.eq.s32.totalorder %v38_v29, 15 }
  0x15   :  { %v70_v3 = vld.sshfl [vmem:[#allocation1] sm:$0xff pattern:$0x73625140]  ;;  %v71_v4 = vld.sshfl [vmem:[#allocation1 + $0x8] sm:$0xff pattern:$0x73625140] }
  0x16   :  { %61 = vrot.lane.b32.xlu0 %v56_v2, %s255_s11  ;;  %74 = vrot.lane.b32.xlu1 %v70_v3, %s256_s12  ;;  %83 = vst [vmem:[#allocation1] ss:$4 sm:$0xff] %v23_v0 }
  0x1d   :  { %v84_v13 = vld.sshfl [vmem:[#allocation1] sm:$0xff pattern:$0x73625140]  ;;  %v85_v15 = vld.sshfl [vmem:[#allocation1 + $0x8] sm:$0xff pattern:$0x73625140] }
  0x1e   :  { %76 = vrot.lane.b32.xlu1 %v71_v4, %s256_s12 }
  0x80   :  { %v60_v6 = vpop.permute.xlu0 %59 }
  0x88   :  { %v62_v8 = vpop.permute.xlu0 %61  ;;  %v75_v9 = vpop.permute.xlu1 %74 }
  0x89   :  { %v64_v10 = vsel %vm51_vm0, %v62_v8, %v60_v6  ;;  %v63_v14 = vsel %vm51_vm0, %v60_v6, %v62_v8 }
  0x8a   :  { %v65_v12 = vsel %vm51_vm0, 0.0, %v64_v10  ;;  %v89_v18 = vadd.f32 %v85_v15, %v63_v14 }
  0x8b   :  { %v88_v16 = vadd.f32 %v84_v13, %v65_v12 }
  0x90   :  { %v77_v17 = vpop.permute.xlu1 %76 }
  0x91   :  { %v79_v19 = vsel %vm78_vm1, %v75_v9, %v77_v17  ;;  %v80_v20 = vsel %vm78_vm1, %v77_v17, %v75_v9 }
  0x92   :  { %v82_v21 = vsel %vm68_vm2, 0.0, %v80_v20  ;;  %v90_v22 = vadd.f32 %v88_v16, %v79_v19  ;;  %v92_v23 = vsub.f32 %v79_v19, %v65_v12 }
  0x93   :  { %v91_v24 = vadd.f32 %v89_v18, %v82_v21  ;;  %v93_v25 = vsub.f32 %v82_v21, %v63_v14 }
  0x94   :  { %116 = vrot.lane.b32.xlu2 %v92_v23, %s257_s0  ;;  %96 = vrot.lane.b32.xlu0 %v90_v22, %s257_s0 }
  0x95   :  { %98 = vrot.lane.b32.xlu1 %v91_v24, %s257_s0 }
  0x9c   :  { %107 = vrot.lane.b32.xlu2 %v90_v22, %s258_s13  ;;  %109 = vrot.lane.b32.xlu0 %v91_v24, %s258_s13 }
  0x9d   :  { %124 = vrot.lane.b32.xlu1 %v92_v23, %s258_s13 }
  0xa4   :  { %118 = vrot.lane.b32.xlu2 %v93_v25, %s257_s0 }
  0xac   :  { %126 = vrot.lane.b32.xlu2 %v93_v25, %s258_s13 }
  0xee   :  { %v117_v26 = vpop.permute.xlu2 %116 }
  0xf6   :  { %v108_v27 = vpop.permute.xlu2 %107 }
  0xfe   :  { %v119_v30 = vpop.permute.xlu2 %118 }
  0xff   :  { %v120_v35 = vsel %vm100_vm3, %v117_v26, %v119_v30  ;;  %v121_v36 = vsel %vm100_vm3, %v119_v30, %v117_v26 }
 0x100   :  { %v122_v37 = vsel %vm280_vm4, 0.0, %v121_v36  ;;  %v123_v38 = vsel %vm284_vm5, 0.0, %v120_v35 }
 0x101   :  { %v134_v43 = vadd.f32 %v122_v37, %v92_v23  ;;  %v135_v44 = vadd.f32 %v123_v38, %v93_v25 }
 0x106   :  { %v97_v31 = vpop.permute.xlu0 %96  ;;  %v127_v46 = vpop.permute.xlu2 %126 }
 0x107   :  { %v99_v32 = vpop.permute.xlu1 %98 }
 0x108   :  { %v101_v39 = vsel %vm100_vm3, %v97_v31, %v99_v32  ;;  %v102_v40 = vsel %vm100_vm3, %v99_v32, %v97_v31 }
 0x109   :  { %v103_v47 = vsel %vm280_vm4, 0.0, %v102_v40  ;;  %v104_v48 = vsel %vm284_vm5, 0.0, %v101_v39 }
 0x10e   :  { %v110_v45 = vpop.permute.xlu0 %109 }
 0x10f   :  { %v112_v49 = vsel %vm111_vm6, %v108_v27, %v110_v45  ;;  %v113_v50 = vsel %vm111_vm6, %v110_v45, %v108_v27  ;;  %v125_v51 = vpop.permute.xlu1 %124 }
 0x110   :  { %v114_v52 = vsel %vm293_vm7, 0.0, %v112_v49  ;;  %v115_v53 = vsel %vm297_vm8, 0.0, %v113_v50  ;;  %v128_v54 = vsel %vm111_vm6, %v125_v51, %v127_v46  ;;  %v129_v55 = vsel %vm111_vm6, %v127_v46, %v125_v51 }
 0x111   :  { %v132_v56 = vsub.f32 %v114_v52, %v103_v47  ;;  %v133_v57 = vsub.f32 %v115_v53, %v104_v48  ;;  %v130_v58 = vsel %vm293_vm7, 0.0, %v128_v54  ;;  %v131_v59 = vsel %vm297_vm8, 0.0, %v129_v55 }
 0x112   :  { %v136_v60 = vadd.f32 %v134_v43, %v130_v58  ;;  %v137_v61 = vadd.f32 %v135_v44, %v131_v59 }
 0x113   :  { %v138_v62 = vmul.f32 %v132_v56, %v132_v56  ;;  %v139_v63 = vmul.f32 %v133_v57, %v133_v57 }
 0x114   :  { %v140_v0 = vmul.f32 %v136_v60, %v136_v60  ;;  %v141_v1 = vmul.f32 %v137_v61, %v137_v61 }
 0x116   :  { %v142_v2 = vadd.f32 %v140_v0, %v138_v62  ;;  %v143_v3 = vadd.f32 %v141_v1, %v139_v63 }
 0x118   :  { %198 = vrsqrt.f32 %v142_v2  ;;  %vm151_vm9 = vcmp.eq.f32.partialorder %v142_v2, inf  ;;  %vm163_vm10 = vcmp.eq.f32.partialorder %v143_v3, inf  ;;  %v166_v18 = vand.u32 2147483648, %v143_v3 }
 0x119   :  { %200 = vrsqrt.f32 %v143_v3  ;;  %vm165_vm11 = vcmp.eq.f32.partialorder %v143_v3, 0.0  ;;  %v154_v21 = vand.u32 2147483648, %v142_v2  ;;  %vm153_vm13 = vcmp.eq.f32.partialorder %v142_v2, 0.0 }
 0x11e   :  { %v199_v4 = vpop.eup %198 }
 0x11f   :  { %v201_v5 = vpop.eup %200  ;;  %v145_v6 = vmul.f32 %v199_v4, %v142_v2 }
 0x120   :  { %v157_v7 = vmul.f32 %v201_v5, %v143_v3 }
 0x121   :  { %v146_v8 = vmul.f32 %v199_v4, %v145_v6 }
 0x122   :  { %v158_v9 = vmul.f32 %v201_v5, %v157_v7 }
 0x123   :  { %v147_v10 = vmul.f32 0.5, %v146_v8 }
 0x124   :  { %v159_v11 = vmul.f32 0.5, %v158_v9 }
 0x125   :  { %v148_v12 = vsub.f32 1.5, %v147_v10 }
 0x126   :  { %v160_v13 = vsub.f32 1.5, %v159_v11 }
 0x127   :  { %v149_v14 = vmul.f32 %v199_v4, %v148_v12 }
 0x128   :  { %v161_v15 = vmul.f32 %v201_v5, %v160_v13 }
 0x129   :  { %v150_v16 = vmul.f32 %v149_v14, %v142_v2 }
 0x12a   :  { %v162_v17 = vmul.f32 %v161_v15, %v143_v3 }
 0x12b   :  { %v152_v19 = vsel %vm151_vm9, %v142_v2, %v150_v16 }
 0x12c   :  { %v164_v20 = vsel %vm163_vm10, %v143_v3, %v162_v17  ;;  %v155_v24 = vsel %vm153_vm13, %v154_v21, %v152_v19 }
 0x12d   :  { %v167_v22 = vsel %vm165_vm11, %v166_v18, %v164_v20 }
 0x12e   :  { %v170_v23 = vrot.slane %v167_v22, 6 }
 0x130   :  { %v172_v25 = vsel %vm171_vm12, %v155_v24, %v170_v23 }
 0x131   :  { %174 = vst [vmem:[#allocation5] sm:$0xf] %v172_v25 }
 0x132   :  { %185 = dma.vmem_to_hbm [thread:$0]  %s181_s15, 64, %s183_s18, [#allocation4]  }
 0x133   :  { %252 = dma.done.wait [#allocation4], 64  }
 0x134   :  { %253 = vsyncadd [#allocation4], 4294967232 }
 0x135   :  { %190 = vsyncpa [#allocation3], 1 }
 0x136   :  { %191 = vsyncpa [#allocation4], 1 }

</bundles_post_ra>
